<compile_context>
chip_gen: v7x
topology: tpu7x:2x2x1
jax: 0.10.0
libtpu: 0.0.40
codegen_flags: <defaults>
</compile_context>

<pallas_src>
import jax
import jax.numpy as jnp
from jax.experimental import pallas as pl
from jax.experimental.pallas import tpu as pltpu


def ista_block_kernel(lam_ref, thr_ref, x_ref, gram_ref, phitb_ref,
                      w1f_ref, w2f_ref, w1b_ref, w2b_ref,
                      xpred_ref, sym_ref):
    lam = lam_ref[0]
    thr = thr_ref[0]
    b_sz, n = x_ref.shape
    l1 = b_sz * n            # lanes of the forward chain
    l2 = 2 * l1              # lanes of the fused backward chain

    # ---- gradient step (f32): r = x - lam * x @ PhiTPhi + lam * PhiTb ----
    x = x_ref[...]
    r = x - lam * jnp.dot(x, gram_ref[...], preferred_element_type=jnp.float32)
    r = r + lam * phitb_ref[...]                                   # (B, N)

    # ---- fold batch into the lane axis: (1, B*N), batch-major lanes ----
    xin = jnp.concatenate([r[b:b + 1, :] for b in range(b_sz)], axis=1)

    # ---- boundary masks, hoisted once (position within each N-segment) ----
    base = jax.lax.broadcasted_iota(jnp.int32, (1, n), 1)
    col1 = jnp.tile(base, (1, b_sz))          # (1, B*N)
    col2 = jnp.tile(base, (1, 2 * b_sz))      # (1, 2*B*N)
    m1m, m1p = col1 >= 1, col1 <= n - 2       # valid lanes for taps t-1 / t+1
    m2m, m2p = col2 >= 1, col2 <= n - 2

    # ---- weights (hoisted loads; tap-concatenated in the wrapper) ----
    w1f = w1f_ref[...]        # (32, 3)   f32
    w2f = w2f_ref[...]        # (32, 96)  bf16
    w1b = w1b_ref[...]        # (32, 96)  bf16
    w2b = w2b_ref[...]        # (1, 96)   bf16

    def conv3(h, w_cat, mm, mp):
        """Conv1d (k=3, pad=1) as a single tap-fused matmul. h: (C_in, L) f32."""
        c_in, l = h.shape
        hm = jnp.where(mm, pltpu.roll(h, shift=1, axis=1), 0.0)      # h[t-1]
        hp = jnp.where(mp, pltpu.roll(h, shift=l - 1, axis=1), 0.0)  # h[t+1]
        if c_in == 1:
            # Degenerate contraction (first layer, C_in=1): broadcast MAC (VPU).
            return w_cat[:, 0:1] * hm + w_cat[:, 1:2] * h + w_cat[:, 2:3] * hp
        stacked = jnp.concatenate([hm, h, hp], axis=0).astype(jnp.bfloat16)
        return jnp.dot(w_cat, stacked, preferred_element_type=jnp.float32)

    # ---- forward chain on (*, B*N) ----
    h = jax.nn.relu(conv3(xin, w1f, m1m, m1p))        # (32, B*N)
    x_forward = conv3(h, w2f, m1m, m1p)               # (32, B*N)

    # soft threshold: sign(x)*relu(|x|-thr) == x - clip(x, -thr, thr) (thr >= 0)
    xs = x_forward - jnp.clip(x_forward, -thr, thr)

    # ---- fused backward branches (shared w1b/w2b) on (*, 2*B*N) ----
    hb = jnp.concatenate([xs, x_forward], axis=1)     # (32, 2*B*N)
    hb = jax.nn.relu(conv3(hb, w1b, m2m, m2p))        # (32, 2*B*N)
    out = conv3(hb, w2b, m2m, m2p)                    # (1, 2*B*N)

    # ---- lane-dense slab stores ----
    xpred_ref[...] = out[:, :l1]                      # x_backward (x_pred)
    sym_ref[...] = out[:, l1:] - xin                  # x_est - x_input


def _cat_taps(w):
    # (C_out, C_in, 3) -> (C_out, 3*C_in); column block k holds tap k.
    return jnp.concatenate([w[:, :, 0], w[:, :, 1], w[:, :, 2]], axis=1)


@jax.jit
def basic_block_1d(x, PhiTPhi, PhiTb, params):
    B, N = x.shape
    w1f = _cat_taps(params["conv1_forward"]).astype(jnp.float32)     # (32, 3)
    w2f = _cat_taps(params["conv2_forward"]).astype(jnp.bfloat16)    # (32, 96)
    w1b = _cat_taps(params["conv1_backward"]).astype(jnp.bfloat16)   # (32, 96)
    w2b = _cat_taps(params["conv2_backward"]).astype(jnp.bfloat16)   # (1, 96)

    vmem = pl.BlockSpec(memory_space=pltpu.MemorySpace.VMEM)
    smem = pl.BlockSpec(memory_space=pltpu.MemorySpace.SMEM)

    # Everything fits VMEM with huge headroom at these shapes, so a single
    # gridless invocation is fastest (no per-step pipeline overhead).
    # On v7x a grid=(B,) with dimension_semantics=("parallel",) would engage the
    # second TensorCore, but at B=2 lane-folding gives better MXU fill, so we
    # keep the gridless form.
    x_pred_flat, sym_flat = pl.pallas_call(
        ista_block_kernel,
        out_shape=(jax.ShapeDtypeStruct((1, B * N), jnp.float32),
                   jax.ShapeDtypeStruct((1, B * N), jnp.float32)),
        in_specs=[smem, smem, vmem, vmem, vmem, vmem, vmem, vmem, vmem],
        out_specs=(vmem, vmem),
    )(params["lambda_step"], params["soft_thr"], x, PhiTPhi, PhiTb,
      w1f, w2f, w1b, w2b)

    return x_pred_flat.reshape(B, N), sym_flat.reshape(B, 1, N)


# ---------------------------------------------------------------------------
# Deterministic parameter init (mirrors the PyTorch __init__ shapes)
# ---------------------------------------------------------------------------
def _xavier_normal(key, shape):
    # shape = (C_out, C_in, k) ; PyTorch xavier_normal_ fan computation
    fan_in = shape[1] * shape[2]
    fan_out = shape[0] * shape[2]
    std = (2.0 / (fan_in + fan_out)) ** 0.5
    return std * jax.random.normal(key, shape, jnp.float32)


def init_params(key):
    k1, k2, k3, k4 = jax.random.split(key, 4)
    return {
        "lambda_step": jnp.array([0.5], jnp.float32),
        "soft_thr": jnp.array([0.01], jnp.float32),
        "conv1_forward": _xavier_normal(k1, (32, 1, 3)),
        "conv2_forward": _xavier_normal(k2, (32, 32, 3)),
        "conv1_backward": _xavier_normal(k3, (32, 32, 3)),
        "conv2_backward": _xavier_normal(k4, (1, 32, 3)),
    }


# ---------------------------------------------------------------------------
# Pure-JAX reference (PyTorch semantics, f32 HIGHEST) for correctness check
# ---------------------------------------------------------------------------
def _conv1d_ref(x, w):
    # x: (B, C_in, N), w: (C_out, C_in, 3), padding=1 (cross-correlation)
    n = x.shape[-1]
    xpad = jnp.pad(x, ((0, 0), (0, 0), (1, 1)))
    out = 0.0
    for k in range(3):
        out = out + jnp.einsum("oc,bcn->bon", w[:, :, k], xpad[:, :, k:k + n],
                               precision=jax.lax.Precision.HIGHEST)
    return out


def ref_forward(x, PhiTPhi, PhiTb, p):
    lam = p["lambda_step"][0]
    thr = p["soft_thr"][0]
    r = x - lam * jnp.matmul(x, PhiTPhi, precision=jax.lax.Precision.HIGHEST)
    r = r + lam * PhiTb
    xin = r[:, None, :]
    h = jax.nn.relu(_conv1d_ref(xin, p["conv1_forward"]))
    xf = _conv1d_ref(h, p["conv2_forward"])
    xs = jnp.sign(xf) * jax.nn.relu(jnp.abs(xf) - thr)
    h = jax.nn.relu(_conv1d_ref(xs, p["conv1_backward"]))
    xb = _conv1d_ref(h, p["conv2_backward"])
    x_pred = xb.reshape(-1, xin.shape[-1])
    h = jax.nn.relu(_conv1d_ref(xf, p["conv1_backward"]))
    xe = _conv1d_ref(h, p["conv2_backward"])
    return x_pred, xe - xin


if __name__ == "__main__":
    key = jax.random.PRNGKey(0)
    kp, kx, kg, kb = jax.random.split(key, 4)

    B, N = 2, 128
    params = init_params(kp)

    x = jax.random.normal(kx, (B, N), jnp.float32)
    A = 0.05 * jax.random.normal(kg, (N, N), jnp.float32)
    PhiTPhi = A @ A.T                              # symmetric PSD-ish gram
    PhiTb = jax.random.normal(kb, (B, N), jnp.float32)

    x_pred, symloss = basic_block_1d(x, PhiTPhi, PhiTb, params)
    jax.block_until_ready((x_pred, symloss))

    xp_ref, sym_ref = ref_forward(x, PhiTPhi, PhiTb, params)
    assert x_pred.shape == (B, N) and symloss.shape == (B, 1, N)
    # Kernel uses bf16 MXU operands (f32 accumulation); reference is f32 HIGHEST.
    assert bool(jnp.allclose(x_pred, xp_ref, atol=2e-2, rtol=2e-2))
    assert bool(jnp.allclose(symloss, sym_ref, atol=2e-2, rtol=2e-2))

    print("KERNEL_OK")
</pallas_src>

<mosaic_0001>
module attributes {stable_mosaic.version = 11 : i64} {
  func.func @ista_block_kernel(%arg0: memref<1xf32, #tpu.memory_space<smem>>, %arg1: memref<1xf32, #tpu.memory_space<smem>>, %arg2: memref<2x128xf32, #tpu.memory_space<vmem>>, %arg3: memref<128x128xf32, #tpu.memory_space<vmem>>, %arg4: memref<2x128xf32, #tpu.memory_space<vmem>>, %arg5: memref<32x3xf32, #tpu.memory_space<vmem>>, %arg6: memref<32x96xbf16, #tpu.memory_space<vmem>>, %arg7: memref<32x96xbf16, #tpu.memory_space<vmem>>, %arg8: memref<1x96xbf16, #tpu.memory_space<vmem>>, %arg9: memref<1x256xf32, #tpu.memory_space<vmem>>, %arg10: memref<1x256xf32, #tpu.memory_space<vmem>>) attributes {dimension_semantics = [], scalar_prefetch = 0 : i64, scratch_operands = 0 : i64, tpu.core_type = #tpu.core_type<tc>} {
    %c0 = arith.constant 0 : index
    %0 = memref.load %arg0[%c0] : memref<1xf32, #tpu.memory_space<smem>>
    %c0_0 = arith.constant 0 : index
    %1 = memref.load %arg1[%c0_0] : memref<1xf32, #tpu.memory_space<smem>>
    %c0_1 = arith.constant 0 : index
    %c0_2 = arith.constant 0 : index
    %2 = vector.load %arg2[%c0_1, %c0_2] : memref<2x128xf32, #tpu.memory_space<vmem>>, vector<2x128xf32>
    %c0_3 = arith.constant 0 : index
    %c0_4 = arith.constant 0 : index
    %3 = vector.load %arg3[%c0_3, %c0_4] : memref<128x128xf32, #tpu.memory_space<vmem>>, vector<128x128xf32>
    %cst = arith.constant dense<0.000000e+00> : vector<2x128xf32>
    %4 = tpu.matmul %2, %3, %cst {dimension_numbers = #tpu.dot_dimension_numbers<[1], [0], [0], [1], [0, 0, 1, 1], [], []>} : vector<2x128xf32>, vector<128x128xf32>, vector<2x128xf32> -> vector<2x128xf32>
    %5 = vector.broadcast %0 : f32 to vector<2x128xf32>
    %6 = arith.mulf %5, %4 : vector<2x128xf32>
    %7 = arith.subf %2, %6 : vector<2x128xf32>
    %c0_5 = arith.constant 0 : index
    %c0_6 = arith.constant 0 : index
    %8 = vector.load %arg4[%c0_5, %c0_6] : memref<2x128xf32, #tpu.memory_space<vmem>>, vector<2x128xf32>
    %9 = vector.broadcast %0 : f32 to vector<2x128xf32>
    %10 = arith.mulf %9, %8 : vector<2x128xf32>
    %11 = arith.addf %7, %10 : vector<2x128xf32>
    %12 = vector.extract_strided_slice %11 {offsets = [0, 0], sizes = [1, 128], strides = [1, 1]} : vector<2x128xf32> to vector<1x128xf32>
    %13 = vector.extract_strided_slice %11 {offsets = [1, 0], sizes = [1, 128], strides = [1, 1]} : vector<2x128xf32> to vector<1x128xf32>
    %14 = tpu.concatenate %12, %13 in 1 : vector<1x128xf32>, vector<1x128xf32> -> vector<1x256xf32>
    %15 = tpu.iota {dimensions = array<i32: 1>} : vector<1x128xi32>
    %16 = tpu.concatenate %15, %15 in 1 : vector<1x128xi32>, vector<1x128xi32> -> vector<1x256xi32>
    %17 = tpu.concatenate %15, %15, %15, %15 in 1 : vector<1x128xi32>, vector<1x128xi32>, vector<1x128xi32>, vector<1x128xi32> -> vector<1x512xi32>
    %c1_i32 = arith.constant 1 : i32
    %18 = vector.broadcast %c1_i32 : i32 to vector<1x256xi32>
    %19 = arith.cmpi sge, %16, %18 : vector<1x256xi32>
    %c126_i32 = arith.constant 126 : i32
    %20 = vector.broadcast %c126_i32 : i32 to vector<1x256xi32>
    %21 = arith.cmpi sle, %16, %20 : vector<1x256xi32>
    %c1_i32_7 = arith.constant 1 : i32
    %22 = vector.broadcast %c1_i32_7 : i32 to vector<1x512xi32>
    %23 = arith.cmpi sge, %17, %22 : vector<1x512xi32>
    %c126_i32_8 = arith.constant 126 : i32
    %24 = vector.broadcast %c126_i32_8 : i32 to vector<1x512xi32>
    %25 = arith.cmpi sle, %17, %24 : vector<1x512xi32>
    %c0_9 = arith.constant 0 : index
    %c0_10 = arith.constant 0 : index
    %26 = vector.load %arg5[%c0_9, %c0_10] : memref<32x3xf32, #tpu.memory_space<vmem>>, vector<32x3xf32>
    %c0_11 = arith.constant 0 : index
    %c0_12 = arith.constant 0 : index
    %27 = vector.load %arg6[%c0_11, %c0_12] : memref<32x96xbf16, #tpu.memory_space<vmem>>, vector<32x96xbf16>
    %c0_13 = arith.constant 0 : index
    %c0_14 = arith.constant 0 : index
    %28 = vector.load %arg7[%c0_13, %c0_14] : memref<32x96xbf16, #tpu.memory_space<vmem>>, vector<32x96xbf16>
    %c0_15 = arith.constant 0 : index
    %c0_16 = arith.constant 0 : index
    %29 = vector.load %arg8[%c0_15, %c0_16] : memref<1x96xbf16, #tpu.memory_space<vmem>>, vector<1x96xbf16>
    %c1_i32_17 = arith.constant 1 : i32
    %30 = tpu.dynamic_rotate %14 by %c1_i32_17 dim 1 : vector<1x256xf32>, i32 -> vector<1x256xf32>
    %cst_18 = arith.constant 0.000000e+00 : f32
    %31 = vector.broadcast %cst_18 : f32 to vector<1x256xf32>
    %32 = arith.select %19, %30, %31 : vector<1x256xi1>, vector<1x256xf32>
    %c255_i32 = arith.constant 255 : i32
    %33 = tpu.dynamic_rotate %14 by %c255_i32 dim 1 : vector<1x256xf32>, i32 -> vector<1x256xf32>
    %cst_19 = arith.constant 0.000000e+00 : f32
    %34 = vector.broadcast %cst_19 : f32 to vector<1x256xf32>
    %35 = arith.select %21, %33, %34 : vector<1x256xi1>, vector<1x256xf32>
    %36 = vector.extract_strided_slice %26 {offsets = [0, 0], sizes = [32, 1], strides = [1, 1]} : vector<32x3xf32> to vector<32x1xf32>
    %37 = vector.broadcast %36 : vector<32x1xf32> to vector<32x256xf32>
    %38 = vector.broadcast %32 : vector<1x256xf32> to vector<32x256xf32>
    %39 = arith.mulf %37, %38 : vector<32x256xf32>
    %40 = vector.extract_strided_slice %26 {offsets = [0, 1], sizes = [32, 1], strides = [1, 1]} : vector<32x3xf32> to vector<32x1xf32>
    %41 = vector.broadcast %40 : vector<32x1xf32> to vector<32x256xf32>
    %42 = vector.broadcast %14 : vector<1x256xf32> to vector<32x256xf32>
    %43 = arith.mulf %41, %42 : vector<32x256xf32>
    %44 = arith.addf %39, %43 : vector<32x256xf32>
    %45 = vector.extract_strided_slice %26 {offsets = [0, 2], sizes = [32, 1], strides = [1, 1]} : vector<32x3xf32> to vector<32x1xf32>
    %46 = vector.broadcast %45 : vector<32x1xf32> to vector<32x256xf32>
    %47 = vector.broadcast %35 : vector<1x256xf32> to vector<32x256xf32>
    %48 = arith.mulf %46, %47 : vector<32x256xf32>
    %49 = arith.addf %44, %48 : vector<32x256xf32>
    %cst_20 = arith.constant 0.000000e+00 : f32
    %50 = vector.broadcast %cst_20 : f32 to vector<32x256xf32>
    %51 = arith.maximumf %49, %50 : vector<32x256xf32>
    %c1_i32_21 = arith.constant 1 : i32
    %52 = tpu.dynamic_rotate %51 by %c1_i32_21 dim 1 : vector<32x256xf32>, i32 -> vector<32x256xf32>
    %cst_22 = arith.constant 0.000000e+00 : f32
    %53 = vector.shape_cast %19 : vector<1x256xi1> to vector<1x256xi1>
    %54 = vector.broadcast %53 : vector<1x256xi1> to vector<32x256xi1>
    %55 = vector.broadcast %cst_22 : f32 to vector<32x256xf32>
    %56 = arith.select %54, %52, %55 : vector<32x256xi1>, vector<32x256xf32>
    %c255_i32_23 = arith.constant 255 : i32
    %57 = tpu.dynamic_rotate %51 by %c255_i32_23 dim 1 : vector<32x256xf32>, i32 -> vector<32x256xf32>
    %cst_24 = arith.constant 0.000000e+00 : f32
    %58 = vector.shape_cast %21 : vector<1x256xi1> to vector<1x256xi1>
    %59 = vector.broadcast %58 : vector<1x256xi1> to vector<32x256xi1>
    %60 = vector.broadcast %cst_24 : f32 to vector<32x256xf32>
    %61 = arith.select %59, %57, %60 : vector<32x256xi1>, vector<32x256xf32>
    %62 = tpu.concatenate %56, %51, %61 in 0 : vector<32x256xf32>, vector<32x256xf32>, vector<32x256xf32> -> vector<96x256xf32>
    %63 = arith.truncf %62 : vector<96x256xf32> to vector<96x256xbf16>
    %cst_25 = arith.constant dense<0.000000e+00> : vector<32x256xf32>
    %64 = tpu.matmul %27, %63, %cst_25 {dimension_numbers = #tpu.dot_dimension_numbers<[1], [0], [0], [1], [0, 0, 1, 1], [], []>} : vector<32x96xbf16>, vector<96x256xbf16>, vector<32x256xf32> -> vector<32x256xf32>
    %cst_26 = arith.constant 0.000000e+00 : f32
    %65 = arith.subf %cst_26, %1 : f32
    %66 = vector.broadcast %65 : f32 to vector<32x256xf32>
    %67 = arith.maximumf %66, %64 : vector<32x256xf32>
    %68 = vector.broadcast %1 : f32 to vector<32x256xf32>
    %69 = arith.minimumf %68, %67 : vector<32x256xf32>
    %70 = arith.subf %64, %69 : vector<32x256xf32>
    %71 = tpu.concatenate %70, %64 in 1 : vector<32x256xf32>, vector<32x256xf32> -> vector<32x512xf32>
    %c1_i32_27 = arith.constant 1 : i32
    %72 = tpu.dynamic_rotate %71 by %c1_i32_27 dim 1 : vector<32x512xf32>, i32 -> vector<32x512xf32>
    %cst_28 = arith.constant 0.000000e+00 : f32
    %73 = vector.shape_cast %23 : vector<1x512xi1> to vector<1x512xi1>
    %74 = vector.broadcast %73 : vector<1x512xi1> to vector<32x512xi1>
    %75 = vector.broadcast %cst_28 : f32 to vector<32x512xf32>
    %76 = arith.select %74, %72, %75 : vector<32x512xi1>, vector<32x512xf32>
    %c511_i32 = arith.constant 511 : i32
    %77 = tpu.dynamic_rotate %71 by %c511_i32 dim 1 : vector<32x512xf32>, i32 -> vector<32x512xf32>
    %cst_29 = arith.constant 0.000000e+00 : f32
    %78 = vector.shape_cast %25 : vector<1x512xi1> to vector<1x512xi1>
    %79 = vector.broadcast %78 : vector<1x512xi1> to vector<32x512xi1>
    %80 = vector.broadcast %cst_29 : f32 to vector<32x512xf32>
    %81 = arith.select %79, %77, %80 : vector<32x512xi1>, vector<32x512xf32>
    %82 = tpu.concatenate %76, %71, %81 in 0 : vector<32x512xf32>, vector<32x512xf32>, vector<32x512xf32> -> vector<96x512xf32>
    %83 = arith.truncf %82 : vector<96x512xf32> to vector<96x512xbf16>
    %cst_30 = arith.constant dense<0.000000e+00> : vector<32x512xf32>
    %84 = tpu.matmul %28, %83, %cst_30 {dimension_numbers = #tpu.dot_dimension_numbers<[1], [0], [0], [1], [0, 0, 1, 1], [], []>} : vector<32x96xbf16>, vector<96x512xbf16>, vector<32x512xf32> -> vector<32x512xf32>
    %cst_31 = arith.constant 0.000000e+00 : f32
    %85 = vector.broadcast %cst_31 : f32 to vector<32x512xf32>
    %86 = arith.maximumf %84, %85 : vector<32x512xf32>
    %c1_i32_32 = arith.constant 1 : i32
    %87 = tpu.dynamic_rotate %86 by %c1_i32_32 dim 1 : vector<32x512xf32>, i32 -> vector<32x512xf32>
    %cst_33 = arith.constant 0.000000e+00 : f32
    %88 = vector.shape_cast %23 : vector<1x512xi1> to vector<1x512xi1>
    %89 = vector.broadcast %88 : vector<1x512xi1> to vector<32x512xi1>
    %90 = vector.broadcast %cst_33 : f32 to vector<32x512xf32>
    %91 = arith.select %89, %87, %90 : vector<32x512xi1>, vector<32x512xf32>
    %c511_i32_34 = arith.constant 511 : i32
    %92 = tpu.dynamic_rotate %86 by %c511_i32_34 dim 1 : vector<32x512xf32>, i32 -> vector<32x512xf32>
    %cst_35 = arith.constant 0.000000e+00 : f32
    %93 = vector.shape_cast %25 : vector<1x512xi1> to vector<1x512xi1>
    %94 = vector.broadcast %93 : vector<1x512xi1> to vector<32x512xi1>
    %95 = vector.broadcast %cst_35 : f32 to vector<32x512xf32>
    %96 = arith.select %94, %92, %95 : vector<32x512xi1>, vector<32x512xf32>
    %97 = tpu.concatenate %91, %86, %96 in 0 : vector<32x512xf32>, vector<32x512xf32>, vector<32x512xf32> -> vector<96x512xf32>
    %98 = arith.truncf %97 : vector<96x512xf32> to vector<96x512xbf16>
    %cst_36 = arith.constant dense<0.000000e+00> : vector<1x512xf32>
    %99 = tpu.matmul %29, %98, %cst_36 {dimension_numbers = #tpu.dot_dimension_numbers<[1], [0], [0], [1], [0, 0, 1, 1], [], []>} : vector<1x96xbf16>, vector<96x512xbf16>, vector<1x512xf32> -> vector<1x512xf32>
    %100 = vector.extract_strided_slice %99 {offsets = [0, 0], sizes = [1, 256], strides = [1, 1]} : vector<1x512xf32> to vector<1x256xf32>
    %c0_37 = arith.constant 0 : index
    %c0_38 = arith.constant 0 : index
    %101 = vector.load %arg9[%c0_37, %c0_38] : memref<1x256xf32, #tpu.memory_space<vmem>>, vector<1x256xf32>
    tpu.vector_store %arg9[%c0_37, %c0_38], %100 {strides = array<i32>} : memref<1x256xf32, #tpu.memory_space<vmem>>, vector<1x256xf32>,
    %102 = vector.extract_strided_slice %99 {offsets = [0, 256], sizes = [1, 256], strides = [1, 1]} : vector<1x512xf32> to vector<1x256xf32>
    %103 = arith.subf %102, %14 : vector<1x256xf32>
    %c0_39 = arith.constant 0 : index
    %c0_40 = arith.constant 0 : index
    %104 = vector.load %arg10[%c0_39, %c0_40] : memref<1x256xf32, #tpu.memory_space<vmem>>, vector<1x256xf32>
    tpu.vector_store %arg10[%c0_39, %c0_40], %103 {strides = array<i32>} : memref<1x256xf32, #tpu.memory_space<vmem>>, vector<1x256xf32>,
    return
  }
}

</mosaic_0001>

<bundles_post_ra>
// kernel: basic_block_1d.1
= control target key start
LH: loop header
LB: loop body
LE: loop exit
PB: predicated region body
PF: predicated region fallthrough
CT: control target
= control target key end

     0   :  { %18 = vsyncpa [#allocation5], 0  ;;  %v1558_v3 = vmov 0.0|0.0   ;;  %vm1559_vm0 = vmmov 0   ;;  %v1560_v6 = vmov 0.0   ;;  %v1561_v7 = vmov 1   ;;  %s2255_s0 = inlined_call_operand.<no memory space> [shape: f32[1], index: 0, kind: input, shape index: {}]   ;;  %s2256_s1 = inlined_call_operand.<no memory space> [shape: f32[1], index: 1, kind: input, shape index: {}]   ;;  %s2257_s2 = inlined_call_operand.vmem [shape: f32[2,128], index: 2, kind: input, shape index: {}]   ;;  %s2258_s3 = inlined_call_operand.vmem [shape: f32[128,128], index: 3, kind: input, shape index: {}]   ;;  %s2259_s4 = inlined_call_operand.vmem [shape: f32[2,128], index: 4, kind: input, shape index: {}]   ;;  %s2260_s5 = inlined_call_operand.vmem [shape: f32[32,3], index: 5, kind: input, shape index: {}]   ;;  %s2261_s6 = inlined_call_operand.vmem [shape: bf16[32,96], index: 6, kind: input, shape index: {}]   ;;  %s2262_s7 = inlined_call_operand.vmem [shape: bf16[32,96], index: 7, kind: input, shape index: {}]   ;;  %s2263_s8 = inlined_call_operand.vmem [shape: bf16[1,96], index: 8, kind: input, shape index: {}]   ;;  %s2264_s9 = inlined_call_operand.hbm [shape: f32[1,256], index: 9, kind: output, shape index: {0}]   ;;  %s2265_s10 = inlined_call_operand.hbm [shape: f32[1,256], index: 10, kind: output, shape index: {1}]  }
   0x1   :  { %v42_v0 = vld [vmem:[%s2258_s3] sm:$0xff]  ;;  %v43_v1 = vld [vmem:[%s2258_s3 + $0x8] sm:$0xff]  ;;  %v44_v2 = vld [vmem:[%s2258_s3 + $0x10] sm:$0xff]  ;;  %1264 = vmatprep.subr.bf16.mxu0 %v1558_v3  ;;  %1261 = vmatprep.mubr.msk.f32.mxu0 %vm1559_vm0, %v1560_v6  ;;  %v1562_v8 = vmov 0  }
   0x2   :  { %v1265_v4 = vpack.c.bf16 %v43_v1, %v42_v0  ;;  %v45_v5 = vld [vmem:[%s2258_s3 + $0x18] sm:$0xff]  ;;  %1300 = vset.pattern.permute.xlu1 %v1561_v7  ;;  %1299 = vset.pattern.permute.xlu0 %v1562_v8  ;;  %v46_v10 = vld [vmem:[%s2258_s3 + $0x20] sm:$0xff]  ;;  %v47_v11 = vld [vmem:[%s2258_s3 + $0x28] sm:$0xff] }
   0x3   :  { %v1268_v9 = vpack.c.bf16 %v45_v5, %v44_v2  ;;  %433 = vmatprep.mubr.bf16.mxu1 %v1562_v8  ;;  %v141_v12 = vld [vmem:[%s2260_s5] sm:$0xff]  ;;  %v48_v13 = vld [vmem:[%s2258_s3 + $0x30] sm:$0xff]  ;;  %v49_v14 = vld [vmem:[%s2258_s3 + $0x38] sm:$0xff]  ;;  %v1271_v16 = vpack.c.bf16 %v47_v11, %v46_v10 }
   0x4   :  { %1266 = vmatpush3.bf16.msra.mxu0 %v1265_v4  ;;  %209 = vperm.xlu1 %1300, %v141_v12   ;;  %v142_v15 = vld [vmem:[%s2260_s5 + $0x8] sm:$0xff] }
   0x5   :  { %1267 = vmatprep.subr.bf16.mxu0 %v1558_v3  ;;  %174 = vperm.xlu0 %1299, %v141_v12  }
   0x8   :  { %1269 = vmatpush3.bf16.msra.mxu0 %v1268_v9 }
   0x9   :  { %1270 = vmatprep.subr.bf16.mxu0 %v1558_v3 }
   0xa   :  { %19 = vsyncpa [#allocation7], 0  ;;  %213 = vperm.xlu1 %1300, %v142_v15   ;;  %179 = vperm.xlu0 %1299, %v142_v15   ;;  %v1274_v17 = vpack.c.bf16 %v49_v14, %v48_v13  ;;  %v50_v18 = vld [vmem:[%s2258_s3 + $0x40] sm:$0xff]  ;;  %v51_v19 = vld [vmem:[%s2258_s3 + $0x48] sm:$0xff]  ;;  %v1563_v21 = vmov 2   ;;  %v128_v34 = vstv %s2255_s0  ;;  %s1565_s17 = smov 1   ;;  %v137_v51 = vlaneseq }
   0xb   :  { %v144_v20 = vld [vmem:[%s2260_s5 + $0x18] sm:$0xff]  ;;  %v1277_v22 = vpack.c.bf16 %v51_v19, %v50_v18  ;;  %v52_v23 = vld [vmem:[%s2258_s3 + $0x50] sm:$0xff]  ;;  %v54_v27 = vld [vmem:[%s2258_s3 + $0x60] sm:$0xff]  ;;  %vm394_vm9 = vcmask 785408   ;;  %s454_s22 = ssub.f32 0.0, %s2256_s1 }
   0xc   :  { %1272 = vmatpush3.bf16.msra.mxu0 %v1271_v16  ;;  %v53_v24 = vld [vmem:[%s2258_s3 + $0x58] sm:$0xff]  ;;  %v143_v25 = vld [vmem:[%s2260_s5 + $0x10] sm:$0xff]  ;;  %v55_v28 = vld [vmem:[%s2258_s3 + $0x68] sm:$0xff]  ;;  %v1721_v53 = vshrl.u32 %v137_v51, 7  ;;  %v1724_v55 = vand.u32 127, %v137_v51  ;;  %s1568_s5 = smov [#allocation6]  }
   0xd   :  { %1273 = vmatprep.subr.bf16.mxu0 %v1558_v3  ;;  %v1280_v26 = vpack.c.bf16 %v53_v24, %v52_v23  ;;  %v1283_v29 = vpack.c.bf16 %v55_v28, %v54_v27  ;;  %v56_v30 = vld [vmem:[%s2258_s3 + $0x70] sm:$0xff]  ;;  %v57_v31 = vld [vmem:[%s2258_s3 + $0x78] sm:$0xff]  ;;  %v41_v33 = vld [vmem:[%s2257_s2] sm:$0x3]  ;;  %s1564_s2 = smov 127   ;;  %s1068_s29 = sshll.u32 %s1568_s5, 4  ;;  %s1069_s29 = int_to_ptr.vmem [resolvable:$true] %s1068_s29 }
   0xe   :  { %1301 = vset.pattern.permute.xlu1 %v1563_v21  ;;  %189 = vperm.xlu0 %1299, %v144_v20   ;;  %v1286_v32 = vpack.c.bf16 %v57_v31, %v56_v30  ;;  %v131_v35 = vld [vmem:[%s2259_s4] sm:$0x3]  ;;  %v1727_v56 = vsub.s32 0, %v1721_v53  ;;  %vm158_vm1 = vcmp.lt.s32.totalorder %v1724_v55, 1  ;;  %vm167_vm2 = vcmp.lt.s32.totalorder %v1724_v55, 127 }
   0xf   :  { %253 = vperm.xlu1 %1301, %v142_v15   ;;  %v132_v38 = vmul.f32 %v131_v35, %v128_v34  ;;  %vm140_vm3 = vcmp.le.s32.totalorder %v1724_v55, 126  ;;  %vm139_vm4 = vcmp.ge.s32.totalorder %v1724_v55, 1  ;;  %v1566_v55 = vmov 1966171168  }
  0x10   :  { %1275 = vmatpush3.bf16.msra.mxu0 %v1274_v17  ;;  %vm1028_vm10 = vcmp.lt.s32.totalorder %v137_v51, 256 }
  0x11   :  { %1276 = vmatprep.subr.bf16.mxu0 %v1558_v3 }
  0x12   :  { %1303 = vset.pattern.permute.xlu0 %v1563_v21 }
  0x13   :  { %1302 = vset.pattern.permute.xlu1 %v1562_v8  ;;  %249 = vperm.xlu0 %1303, %v141_v12  }
  0x14   :  { %1278 = vmatpush3.bf16.msra.mxu0 %v1277_v22  ;;  %184 = vperm.xlu1 %1302, %v143_v25  }
  0x15   :  { %1279 = vmatprep.subr.bf16.mxu0 %v1558_v3 }
  0x18   :  { %1281 = vmatpush3.bf16.msra.mxu0 %v1280_v26  ;;  %1304 = vset.pattern.permute.xlu1 %v1561_v7 }
  0x19   :  { %1282 = vmatprep.subr.bf16.mxu0 %v1558_v3  ;;  %217 = vperm.xlu1 %1304, %v143_v25  }
  0x1c   :  { %1284 = vmatpush3.bf16.msra.mxu0 %v1283_v29 }
  0x1d   :  { %1285 = vmatprep.subr.bf16.mxu0 %v1558_v3  ;;  %221 = vperm.xlu1 %1304, %v144_v20  }
  0x20   :  { %1287 = vmatpush3.bf16.msra.mxu0 %v1286_v32 }
  0x21   :  { %1305 = vset.pattern.permute.xlu1 %v1563_v21 }
  0x23   :  { %1262 = vmatmul.mubr.f32.vlgmr.msra.gmra.mrb[0].mxu0 %v41_v33 }
  0x24   :  { %734 = vmatprep.mubr.bf16.mxu0 %v1562_v8 }
  0x83   :  { %v210_v43 = vpop.permute.xlu1 %209 }
  0x84   :  { %v175_v46 = vpop.permute.xlu0 %174 }
  0x89   :  { %v214_v44 = vpop.permute.xlu1 %213  ;;  %v180_v48 = vpop.permute.xlu0 %179 }
  0x8d   :  { %v190_v50 = vpop.permute.xlu0 %189 }
  0x8e   :  { %v254_v45 = vpop.permute.xlu1 %253 }
  0x92   :  { %v250_v52 = vpop.permute.xlu0 %249 }
  0x93   :  { %v185_v47 = vpop.permute.xlu1 %184 }
  0x98   :  { %v1718_v49 = vpop.permute.xlu1 %217 }
  0x9c   :  { %v222_v54 = vpop.permute.xlu1 %221 }
  0xf6   :  { %v124_v36 = vpop.f32.mrb[0].mxu0 }
  0xf7   :  { %v129_v37 = vmul.f32 %v128_v34, %v124_v36  ;;  %v1263_v39 = vpop.f32.mrb[1].mxu0 }
  0xf9   :  { %v130_v40 = vsub.f32 %v41_v33, %v129_v37 }
  0xfb   :  { %v1705_v41 = vadd.f32 %v132_v38, %v130_v40 }
  0xfd   :  { %163 = vrot.lane.b32.xlu0 %v1705_v41, %s1564_s2  ;;  %154 = vrot.lane.b32.xlu1 %v1705_v41, %s1565_s17  ;;  %v1712_v42 = vrot.slane %v1705_v41, 1  ;;  %v227_v59 = vrot.slane %v1705_v41, %v1727_v56 }
  0xff   :  { %v231_v60 = vrot.slane %v1712_v42, %v1727_v56  ;;  %v232_v12 = vmul.f32 %v227_v59, %v210_v43  ;;  %v234_v13 = vmul.f32 %v227_v59, %v214_v44 }
 0x101   :  { %165 = vrot.lane.b32.xlu1 %v1712_v42, %s1564_s2  ;;  %156 = vrot.lane.b32.xlu0 %v1712_v42, %s1565_s17  ;;  %v233_v14 = vmul.f32 %v231_v60, %v210_v43  ;;  %v235_v15 = vmul.f32 %v231_v60, %v214_v44  ;;  %v236_v44 = vmul.f32 %v227_v59, %v1718_v49 }
 0x105   :  { %261 = vperm.xlu1 %1305, %v144_v20   ;;  %257 = vperm.xlu0 %1303, %v143_v25  }
 0x16f   :  { %v164_v57 = vpop.permute.xlu0 %163  ;;  %v155_v58 = vpop.permute.xlu1 %154 }
 0x173   :  { %v166_v61 = vpop.permute.xlu1 %165  ;;  %v157_v62 = vpop.permute.xlu0 %156 }
 0x174   :  { %v168_v63 = vsel %vm167_vm2, %v164_v57, %v166_v61  ;;  %v169_v0 = vsel %vm167_vm2, %v166_v61, %v164_v57  ;;  %v159_v1 = vsel %vm158_vm1, %v155_v58, %v157_v62  ;;  %v160_v2 = vsel %vm158_vm1, %v157_v62, %v155_v58 }
 0x175   :  { %v170_v3 = vsel %vm140_vm3, %v168_v63, 0.0  ;;  %v171_v4 = vsel %vm140_vm3, %v169_v0, 0.0  ;;  %v161_v5 = vsel %vm139_vm4, %v160_v2, 0.0  ;;  %v162_v6 = vsel %vm139_vm4, %v159_v1, 0.0 }
 0x176   :  { %v267_v7 = vrot.slane %v170_v3, %v1727_v56  ;;  %v271_v9 = vrot.slane %v171_v4, %v1727_v56  ;;  %v195_v10 = vrot.slane %v161_v5, %v1727_v56  ;;  %v199_v11 = vrot.slane %v162_v6, %v1727_v56 }
 0x177   :  { %v239_v57 = vmul.f32 %v231_v60, %v222_v54 }
 0x178   :  { %v200_v16 = vmul.f32 %v195_v10, %v175_v46  ;;  %v201_v17 = vmul.f32 %v199_v11, %v175_v46  ;;  %v202_v18 = vmul.f32 %v195_v10, %v180_v48  ;;  %v203_v19 = vmul.f32 %v199_v11, %v180_v48 }
 0x179   :  { %v272_v20 = vmul.f32 %v267_v7, %v250_v52  ;;  %v274_v21 = vmul.f32 %v267_v7, %v254_v45  ;;  %v273_v22 = vmul.f32 %v271_v9, %v250_v52  ;;  %v275_v23 = vmul.f32 %v271_v9, %v254_v45 }
 0x17a   :  { %v240_v24 = vadd.f32 %v232_v12, %v200_v16  ;;  %v242_v25 = vadd.f32 %v234_v13, %v202_v18  ;;  %v241_v26 = vadd.f32 %v233_v14, %v201_v17  ;;  %v243_v27 = vadd.f32 %v235_v15, %v203_v19 }
 0x17b   :  { %v206_v36 = vmul.f32 %v195_v10, %v190_v50  ;;  %v207_v37 = vmul.f32 %v199_v11, %v190_v50  ;;  %v204_v40 = vmul.f32 %v195_v10, %v185_v47  ;;  %v205_v43 = vmul.f32 %v199_v11, %v185_v47 }
 0x17c   :  { %v280_v28 = vadd.f32 %v272_v20, %v240_v24  ;;  %v282_v29 = vadd.f32 %v274_v21, %v242_v25  ;;  %v281_v30 = vadd.f32 %v273_v22, %v241_v26  ;;  %v283_v31 = vadd.f32 %v275_v23, %v243_v27 }
 0x17d   :  { %v237_v48 = vmul.f32 %v231_v60, %v1718_v49  ;;  %v238_v52 = vmul.f32 %v227_v59, %v222_v54  ;;  %v247_v61 = vadd.f32 %v239_v57, %v207_v37  ;;  %v244_v62 = vadd.f32 %v236_v44, %v204_v40 }
 0x17e   :  { %v288_v32 = vmax.f32 %v280_v28, 0.0  ;;  %v290_v33 = vmax.f32 %v282_v29, 0.0  ;;  %v289_v34 = vmax.f32 %v281_v30, 0.0  ;;  %v291_v35 = vmax.f32 %v283_v31, 0.0 }
 0x17f   :  { %v246_v50 = vadd.f32 %v238_v52, %v206_v36  ;;  %v245_v47 = vadd.f32 %v237_v48, %v205_v43 }
 0x180   :  { %v1306_v38 = vpack.i.bf16 %v290_v33, %v288_v32  ;;  %v1311_v39 = vpack.i.bf16 %v291_v35, %v289_v34  ;;  %v1758_v45 = vpack.c.bf16 %v291_v35, %v289_v34  ;;  %v1760_v46 = vpack.c.bf16 %v290_v33, %v288_v32 }
 0x181   :  { %v358_v34 = vsel %vm140_vm3, 1, %v1562_v8 }
 0x182   :  { %1307 = vrot.lane.b32.xlu1 %v1306_v38, %s1565_s17  ;;  %1312 = vrot.lane.b32.xlu0 %v1311_v39, %s1565_s17  ;;  %v362_v48 = vrot.slane %v358_v34, %v1727_v56 }
 0x184   :  { %v262_v58 = vpop.permute.xlu1 %261  ;;  %v258_v63 = vpop.permute.xlu0 %257  ;;  %vm363_vm7 = vcmp.eq.s32.totalorder %v362_v48, 1 }
 0x185   :  { %v278_v0 = vmul.f32 %v267_v7, %v262_v58  ;;  %v279_v1 = vmul.f32 %v271_v9, %v262_v58  ;;  %v276_v2 = vmul.f32 %v267_v7, %v258_v63  ;;  %v277_v3 = vmul.f32 %v271_v9, %v258_v63  ;;  %vm1815_vm8 = vmpackc.low %vm363_vm7, %vm363_vm7 }
 0x186   :  { %v320_v7 = vsel %vm139_vm4, 1, %v1562_v8 }
 0x187   :  { %v286_v4 = vadd.f32 %v278_v0, %v246_v50  ;;  %v287_v5 = vadd.f32 %v279_v1, %v247_v61  ;;  %v284_v6 = vadd.f32 %v276_v2, %v244_v62  ;;  %v285_v49 = vadd.f32 %v277_v3, %v245_v47 }
 0x188   :  { %v324_v9 = vrot.slane %v320_v7, %v1727_v56  ;;  %v464_v7 = vstv %s2256_s1 }
 0x189   :  { %v294_v59 = vmax.f32 %v286_v4, 0.0  ;;  %v295_v54 = vmax.f32 %v287_v5, 0.0  ;;  %v292_v60 = vmax.f32 %v284_v6, 0.0  ;;  %v293_v10 = vmax.f32 %v285_v49, 0.0 }
 0x18a   :  { %vm325_vm5 = vcmp.eq.s32.totalorder %v324_v9, 1 }
 0x18b   :  { %v1316_v11 = vpack.i.bf16 %v294_v59, %v292_v60  ;;  %v1321_v12 = vpack.i.bf16 %v295_v54, %v293_v10  ;;  %v379_v13 = vpack.c.bf16 %v295_v54, %v293_v10  ;;  %v1765_v14 = vpack.c.bf16 %v294_v59, %v292_v60  ;;  %vm1777_vm6 = vmpackc.low %vm325_vm5, %vm325_vm5 }
 0x18d   :  { %1317 = vrot.lane.b32.xlu1 %v1316_v11, %s1565_s17  ;;  %1322 = vrot.lane.b32.xlu0 %v1321_v12, %s1565_s17 }
 0x191   :  { %1327 = vrot.lane.b32.xlu1 %v1306_v38, %s1564_s2  ;;  %1332 = vrot.lane.b32.xlu0 %v1311_v39, %s1564_s2 }
 0x195   :  { %1337 = vrot.lane.b32.xlu1 %v1316_v11, %s1564_s2  ;;  %1342 = vrot.lane.b32.xlu0 %v1321_v12, %s1564_s2  ;;  %v1506_v11 = vld [vmem:[%s2261_s6] sm:$0xff]   ;;  %v1507_v12 = vld [vmem:[%s2261_s6 + $0x8] sm:$0xff]  }
 0x1f4   :  { %v1308_v15 = vpop.permute.xlu1 %1307  ;;  %v1313_v16 = vpop.permute.xlu0 %1312 }
 0x1f5   :  { %v1310_v17 = vunpack.i.h.bf16 %v1308_v15  ;;  %v1309_v18 = vunpack.i.l.bf16 %v1308_v15  ;;  %v1315_v19 = vunpack.i.h.bf16 %v1313_v16  ;;  %v1314_v20 = vunpack.i.l.bf16 %v1313_v16 }
 0x1f7   :  { %v312_v22 = vsel %vm158_vm1, %v1309_v18, %v1314_v20  ;;  %v313_v23 = vsel %vm158_vm1, %v1310_v17, %v1315_v19  ;;  %v316_v24 = vsel %vm158_vm1, %v1314_v20, %v1309_v18  ;;  %v317_v25 = vsel %vm158_vm1, %v1315_v19, %v1310_v17 }
 0x1f8   :  { %v1083_v26 = vpack.c.bf16 %v313_v23, %v312_v22  ;;  %v1086_v27 = vpack.c.bf16 %v317_v25, %v316_v24 }
 0x1fa   :  { %1084 = vmatprep.subr.msk.bf16.mxu1 %vm1777_vm6, %v1083_v26 }
 0x1fb   :  { %1087 = vmatpush1.bf16.msk.msra.mxu1 %vm1777_vm6, %v1086_v27 }
 0x1ff   :  { %v1318_v28 = vpop.permute.xlu1 %1317  ;;  %v1323_v29 = vpop.permute.xlu0 %1322 }
 0x200   :  { %v1320_v30 = vunpack.i.h.bf16 %v1318_v28  ;;  %v1319_v31 = vunpack.i.l.bf16 %v1318_v28  ;;  %v1325_v32 = vunpack.i.h.bf16 %v1323_v29  ;;  %v1324_v33 = vunpack.i.l.bf16 %v1323_v29 }
 0x202   :  { %v315_v35 = vsel %vm158_vm1, %v1320_v30, %v1325_v32  ;;  %v319_v36 = vsel %vm158_vm1, %v1325_v32, %v1320_v30  ;;  %v314_v37 = vsel %vm158_vm1, %v1319_v31, %v1324_v33  ;;  %v318_v38 = vsel %vm158_vm1, %v1324_v33, %v1319_v31 }
 0x203   :  { %v1089_v39 = vpack.c.bf16 %v315_v35, %v314_v37  ;;  %v1092_v40 = vpack.c.bf16 %v319_v36, %v318_v38  ;;  %v1328_v43 = vpop.permute.xlu1 %1327  ;;  %v1333_v44 = vpop.permute.xlu0 %1332 }
 0x204   :  { %v1330_v52 = vunpack.i.h.bf16 %v1328_v43  ;;  %v1329_v57 = vunpack.i.l.bf16 %v1328_v43  ;;  %v1335_v58 = vunpack.i.h.bf16 %v1333_v44  ;;  %v1334_v50 = vunpack.i.l.bf16 %v1333_v44 }
 0x205   :  { %1090 = vmatprep.subr.msk.bf16.mxu1 %vm1777_vm6, %v1089_v39 }
 0x206   :  { %1093 = vmatpush1.bf16.msk.msra.mxu1 %vm1777_vm6, %v1092_v40  ;;  %v355_v63 = vsel %vm167_vm2, %v1335_v58, %v1330_v52  ;;  %v354_v56 = vsel %vm167_vm2, %v1334_v50, %v1329_v57  ;;  %v350_v4 = vsel %vm167_vm2, %v1329_v57, %v1334_v50 }
 0x207   :  { %v1338_v61 = vpop.permute.xlu1 %1337  ;;  %v1343_v62 = vpop.permute.xlu0 %1342  ;;  %405 = vmatprep.subr.bf16.mxu1 %v1758_v45  ;;  %v351_v45 = vsel %vm167_vm2, %v1330_v52, %v1335_v58  ;;  %v1095_v5 = vpack.c.bf16 %v355_v63, %v354_v56 }
 0x208   :  { %v1340_v47 = vunpack.i.h.bf16 %v1338_v61  ;;  %v1339_v0 = vunpack.i.l.bf16 %v1338_v61  ;;  %v1345_v1 = vunpack.i.h.bf16 %v1343_v62  ;;  %v1344_v2 = vunpack.i.l.bf16 %v1343_v62 }
 0x20a   :  { %406 = vmatpush1.bf16.msra.mxu1 %v1760_v46  ;;  %v357_v6 = vsel %vm167_vm2, %v1345_v1, %v1340_v47  ;;  %v356_v49 = vsel %vm167_vm2, %v1344_v2, %v1339_v0  ;;  %v1098_v46 = vpack.c.bf16 %v351_v45, %v350_v4  ;;  %v353_v59 = vsel %vm167_vm2, %v1340_v47, %v1345_v1 }
 0x20b   :  { %407 = vmatprep.subr.bf16.mxu1 %v379_v13  ;;  %v352_v54 = vsel %vm167_vm2, %v1339_v0, %v1344_v2  ;;  %v1101_v60 = vpack.c.bf16 %v357_v6, %v356_v49  ;;  %v455_v13 = vstv %s454_s22 }
 0x20c   :  { %v1104_v10 = vpack.c.bf16 %v353_v59, %v352_v54 }
 0x20e   :  { %408 = vmatpush1.bf16.msra.mxu1 %v1765_v14 }
 0x20f   :  { %1096 = vmatprep.subr.msk.bf16.mxu1 %vm1815_vm8, %v1095_v5 }
 0x212   :  { %1099 = vmatpush1.bf16.msk.msra.mxu1 %vm1815_vm8, %v1098_v46 }
 0x213   :  { %1102 = vmatprep.subr.msk.bf16.mxu1 %vm1815_vm8, %v1101_v60 }
 0x216   :  { %1105 = vmatpush1.bf16.msk.msra.mxu1 %vm1815_vm8, %v1104_v10 }
 0x219   :  { %1106 = vmatmul.mubr.msk.bf16.vlgmr.msra.gmra.mrb[0].mxu1 %vm394_vm9, %v1506_v11 }
 0x21a   :  { %443 = vmatprep.mubr.bf16.mxu1 %v1562_v8 }
 0x221   :  { %1107 = vmatmul.mubr.msk.bf16.gmra.mrb[4].mxu1 %vm394_vm9, %v1507_v12 }
 0x222   :  { %681 = vmatprep.mubr.bf16.mxu1 %v1562_v8 }
 0x2ec   :  { %v1853_v14 = vpop.f32.mrb[0].mxu1 }
 0x2ed   :  { %v456_v9 = vmax.f32 %v455_v13, %v1853_v14  ;;  %v1859_v15 = vpop.f32.mrb[1].mxu1 }
 0x2ee   :  { %v457_v16 = vmax.f32 %v455_v13, %v1859_v15  ;;  %v1862_v17 = vpop.f32.mrb[2].mxu1 }
 0x2ef   :  { %v458_v18 = vmax.f32 %v455_v13, %v1862_v17  ;;  %v1865_v19 = vpop.f32.mrb[3].mxu1  ;;  %v1346_v20 = vpack.i.bf16 %v1862_v17, %v1853_v14  ;;  %v465_v22 = vmin.f32 %v464_v7, %v456_v9  ;;  %v619_v28 = vpack.c.bf16 %v1862_v17, %v1853_v14 }
 0x2f0   :  { %v459_v23 = vmax.f32 %v455_v13, %v1865_v19  ;;  %v1351_v24 = vpack.i.bf16 %v1865_v19, %v1859_v15  ;;  %v466_v25 = vmin.f32 %v464_v7, %v457_v16  ;;  %v620_v27 = vpack.c.bf16 %v1865_v19, %v1859_v15 }
 0x2f1   :  { %1347 = vrot.lane.b32.xlu1 %v1346_v20, %s1565_s17  ;;  %v467_v26 = vmin.f32 %v464_v7, %v458_v18  ;;  %v1879_v30 = vsub.f32 %v1853_v14, %v465_v22 }
 0x2f2   :  { %1352 = vrot.lane.b32.xlu0 %v1351_v24, %s1565_s17  ;;  %v468_v29 = vmin.f32 %v464_v7, %v459_v23  ;;  %v1887_v33 = vsub.f32 %v1859_v15, %v466_v25 }
 0x2f3   :  { %v1882_v31 = vsub.f32 %v1862_v17, %v467_v26 }
 0x2f4   :  { %v1884_v32 = vpop.f32.mrb[4].mxu1  ;;  %v1890_v34 = vsub.f32 %v1865_v19, %v468_v29 }
 0x2f5   :  { %v460_v35 = vmax.f32 %v455_v13, %v1884_v32  ;;  %v1893_v36 = vpop.f32.mrb[5].mxu1  ;;  %v1356_v37 = vpack.i.bf16 %v1882_v31, %v1879_v30  ;;  %v617_v38 = vpack.c.bf16 %v1882_v31, %v1879_v30 }
 0x2f6   :  { %v461_v39 = vmax.f32 %v455_v13, %v1893_v36  ;;  %v1900_v40 = vpop.f32.mrb[6].mxu1  ;;  %v1361_v43 = vpack.i.bf16 %v1890_v34, %v1887_v33  ;;  %v618_v44 = vpack.c.bf16 %v1890_v34, %v1887_v33 }
 0x2f7   :  { %v462_v48 = vmax.f32 %v455_v13, %v1900_v40  ;;  %1357 = vrot.lane.b32.xlu1 %v1356_v37, %s1565_s17  ;;  %v1908_v52 = vpop.f32.mrb[7].mxu1  ;;  %v1366_v57 = vpack.i.bf16 %v1900_v40, %v1884_v32  ;;  %v469_v58 = vmin.f32 %v464_v7, %v460_v35  ;;  %v623_v47 = vpack.c.bf16 %v1900_v40, %v1884_v32 }
 0x2f8   :  { %v463_v50 = vmax.f32 %v455_v13, %v1908_v52  ;;  %1362 = vrot.lane.b32.xlu0 %v1361_v43, %s1565_s17  ;;  %v1371_v61 = vpack.i.bf16 %v1908_v52, %v1893_v36  ;;  %v470_v62 = vmin.f32 %v464_v7, %v461_v39  ;;  %v624_v56 = vpack.c.bf16 %v1908_v52, %v1893_v36 }
 0x2f9   :  { %v471_v63 = vmin.f32 %v464_v7, %v462_v48  ;;  %v1922_v1 = vsub.f32 %v1884_v32, %v469_v58 }
 0x2fa   :  { %v472_v0 = vmin.f32 %v464_v7, %v463_v50  ;;  %v1929_v45 = vsub.f32 %v1893_v36, %v470_v62 }
 0x2fb   :  { %1367 = vrot.lane.b32.xlu1 %v1366_v57, %s1565_s17  ;;  %v1925_v2 = vsub.f32 %v1900_v40, %v471_v63 }
 0x2fc   :  { %1372 = vrot.lane.b32.xlu0 %v1371_v61, %s1565_s17  ;;  %v1932_v4 = vsub.f32 %v1908_v52, %v472_v0 }
 0x2fd   :  { %v1376_v5 = vpack.i.bf16 %v1925_v2, %v1922_v1  ;;  %v621_v6 = vpack.c.bf16 %v1925_v2, %v1922_v1 }
 0x2fe   :  { %v1386_v49 = vpack.i.bf16 %v1932_v4, %v1929_v45  ;;  %v622_v46 = vpack.c.bf16 %v1932_v4, %v1929_v45 }
 0x2ff   :  { %1377 = vrot.lane.b32.xlu1 %v1376_v5, %s1565_s17 }
 0x300   :  { %1387 = vrot.lane.b32.xlu0 %v1386_v49, %s1565_s17 }
 0x303   :  { %1382 = vrot.lane.b32.xlu1 %v1356_v37, %s1564_s2 }
 0x304   :  { %1392 = vrot.lane.b32.xlu0 %v1351_v24, %s1564_s2 }
 0x307   :  { %1397 = vrot.lane.b32.xlu1 %v1361_v43, %s1564_s2 }
 0x308   :  { %1402 = vrot.lane.b32.xlu0 %v1346_v20, %s1564_s2 }
 0x30b   :  { %1407 = vrot.lane.b32.xlu1 %v1376_v5, %s1564_s2 }
 0x30c   :  { %1412 = vrot.lane.b32.xlu0 %v1371_v61, %s1564_s2 }
 0x30f   :  { %1417 = vrot.lane.b32.xlu1 %v1386_v49, %s1564_s2 }
 0x310   :  { %1422 = vrot.lane.b32.xlu0 %v1366_v57, %s1564_s2 }
 0x363   :  { %v1348_v59 = vpop.permute.xlu1 %1347 }
 0x364   :  { %v1350_v54 = vunpack.i.h.bf16 %v1348_v59  ;;  %v1349_v60 = vunpack.i.l.bf16 %v1348_v59  ;;  %v1353_v10 = vpop.permute.xlu0 %1352 }
 0x365   :  { %v1355_v11 = vunpack.i.h.bf16 %v1353_v10  ;;  %v1354_v12 = vunpack.i.l.bf16 %v1353_v10 }
 0x367   :  { %v514_v13 = vsel %vm158_vm1, %v1350_v54, %v1355_v11  ;;  %v513_v7 = vsel %vm158_vm1, %v1349_v60, %v1354_v12 }
 0x368   :  { %v1137_v9 = vpack.c.bf16 %v514_v13, %v513_v7 }
 0x369   :  { %v1358_v16 = vpop.permute.xlu1 %1357 }
 0x36a   :  { %v1360_v18 = vunpack.i.h.bf16 %v1358_v16  ;;  %v1359_v20 = vunpack.i.l.bf16 %v1358_v16  ;;  %1138 = vmatprep.subr.msk.bf16.mxu0 %vm1777_vm6, %v1137_v9  ;;  %v1363_v22 = vpop.permute.xlu0 %1362 }
 0x36b   :  { %v1365_v23 = vunpack.i.h.bf16 %v1363_v22  ;;  %v1364_v24 = vunpack.i.l.bf16 %v1363_v22 }
 0x36c   :  { %v525_v25 = vsel %vm158_vm1, %v1354_v12, %v1359_v20  ;;  %v526_v26 = vsel %vm158_vm1, %v1355_v11, %v1360_v18 }
 0x36d   :  { %v518_v29 = vsel %vm158_vm1, %v1365_v23, %v1350_v54  ;;  %v522_v35 = vsel %vm158_vm1, %v1360_v18, %v1365_v23  ;;  %v517_v37 = vsel %vm158_vm1, %v1364_v24, %v1349_v60  ;;  %v1368_v39 = vpop.permute.xlu1 %1367  ;;  %v521_v43 = vsel %vm158_vm1, %v1359_v20, %v1364_v24 }
 0x36e   :  { %v1140_v48 = vpack.c.bf16 %v518_v29, %v517_v37  ;;  %v1370_v57 = vunpack.i.h.bf16 %v1368_v39  ;;  %v1369_v58 = vunpack.i.l.bf16 %v1368_v39  ;;  %v1373_v50 = vpop.permute.xlu0 %1372  ;;  %v1111_v61 = vpack.c.bf16 %v522_v35, %v521_v43 }
 0x36f   :  { %v1375_v62 = vunpack.i.h.bf16 %v1373_v50  ;;  %v1374_v63 = vunpack.i.l.bf16 %v1373_v50  ;;  %v1114_v0 = vpack.c.bf16 %v526_v26, %v525_v25 }
 0x370   :  { %1141 = vmatpush1.bf16.msk.msra.mxu0 %vm1777_vm6, %v1140_v48  ;;  %1112 = vmatprep.subr.msk.bf16.mxu1 %vm1777_vm6, %v1111_v61 }
 0x371   :  { %v516_v5 = vsel %vm158_vm1, %v1370_v57, %v1375_v62  ;;  %v515_v49 = vsel %vm158_vm1, %v1369_v58, %v1374_v63  ;;  %v1378_v59 = vpop.permute.xlu1 %1377  ;;  %1115 = vmatpush1.bf16.msk.msra.mxu1 %vm1777_vm6, %v1114_v0 }
 0x372   :  { %v1143_v54 = vpack.c.bf16 %v516_v5, %v515_v49  ;;  %v1380_v60 = vunpack.i.h.bf16 %v1378_v59  ;;  %v1379_v10 = vunpack.i.l.bf16 %v1378_v59  ;;  %v1388_v11 = vpop.permute.xlu0 %1387 }
 0x373   :  { %v1390_v12 = vunpack.i.h.bf16 %v1388_v11  ;;  %v1389_v13 = vunpack.i.l.bf16 %v1388_v11 }
 0x374   :  { %v527_v7 = vsel %vm158_vm1, %v1374_v63, %v1379_v10  ;;  %1144 = vmatprep.subr.msk.bf16.mxu0 %vm1777_vm6, %v1143_v54  ;;  %v528_v9 = vsel %vm158_vm1, %v1375_v62, %v1380_v60 }
 0x375   :  { %v520_v16 = vsel %vm158_vm1, %v1390_v12, %v1370_v57  ;;  %v524_v18 = vsel %vm158_vm1, %v1380_v60, %v1390_v12  ;;  %v519_v20 = vsel %vm158_vm1, %v1389_v13, %v1369_v58  ;;  %v1383_v22 = vpop.permute.xlu1 %1382  ;;  %v523_v23 = vsel %vm158_vm1, %v1379_v10, %v1389_v13 }
 0x376   :  { %v1146_v24 = vpack.c.bf16 %v520_v16, %v519_v20  ;;  %v1385_v25 = vunpack.i.h.bf16 %v1383_v22  ;;  %v1384_v26 = vunpack.i.l.bf16 %v1383_v22  ;;  %v1393_v29 = vpop.permute.xlu0 %1392  ;;  %v1117_v35 = vpack.c.bf16 %v524_v18, %v523_v23  ;;  %v1509_v16 = vld [vmem:[%s2262_s7 + $0x8] sm:$0xff]  }
 0x377   :  { %v1395_v37 = vunpack.i.h.bf16 %v1393_v29  ;;  %v1394_v39 = vunpack.i.l.bf16 %v1393_v29  ;;  %v1120_v43 = vpack.c.bf16 %v528_v9, %v527_v7  ;;  %v1508_v7 = vld [vmem:[%s2262_s7] sm:$0xff]  }
 0x378   :  { %1147 = vmatpush1.bf16.msk.msra.mxu0 %vm1777_vm6, %v1146_v24  ;;  %1118 = vmatprep.subr.msk.bf16.mxu1 %vm1777_vm6, %v1117_v35 }
 0x379   :  { %v1398_v48 = vpop.permute.xlu1 %1397  ;;  %706 = vmatprep.subr.bf16.mxu0 %v620_v27  ;;  %v590_v57 = vsel %vm167_vm2, %v1395_v37, %v1385_v25  ;;  %v589_v58 = vsel %vm167_vm2, %v1394_v39, %v1384_v26  ;;  %1121 = vmatpush1.bf16.msk.msra.mxu1 %vm1777_vm6, %v1120_v43 }
 0x37a   :  { %v1400_v50 = vunpack.i.h.bf16 %v1398_v48  ;;  %v1399_v61 = vunpack.i.l.bf16 %v1398_v48  ;;  %v1403_v62 = vpop.permute.xlu0 %1402  ;;  %653 = vmatprep.subr.bf16.mxu1 %v618_v44  ;;  %v1149_v15 = vpack.c.bf16 %v590_v57, %v589_v58 }
 0x37b   :  { %v1405_v63 = vunpack.i.h.bf16 %v1403_v62  ;;  %v1404_v0 = vunpack.i.l.bf16 %v1403_v62 }
 0x37c   :  { %707 = vmatpush1.bf16.msra.mxu0 %v619_v28  ;;  %v585_v36 = vsel %vm167_vm2, %v1384_v26, %v1399_v61  ;;  %v586_v30 = vsel %vm167_vm2, %v1385_v25, %v1400_v50 }
 0x37d   :  { %v1408_v19 = vpop.permute.xlu1 %1407  ;;  %708 = vmatprep.subr.bf16.mxu0 %v624_v56  ;;  %v582_v27 = vsel %vm167_vm2, %v1400_v50, %v1405_v63  ;;  %v581_v5 = vsel %vm167_vm2, %v1399_v61, %v1404_v0  ;;  %654 = vmatpush1.bf16.msra.mxu1 %v617_v38  ;;  %v577_v17 = vsel %vm167_vm2, %v1404_v0, %v1394_v39 }
 0x37e   :  { %v1410_v49 = vunpack.i.h.bf16 %v1408_v19  ;;  %v1409_v59 = vunpack.i.l.bf16 %v1408_v19  ;;  %v1413_v14 = vpop.permute.xlu0 %1412  ;;  %v578_v28 = vsel %vm167_vm2, %v1405_v63, %v1395_v37  ;;  %655 = vmatprep.subr.bf16.mxu1 %v622_v46  ;;  %v1123_v31 = vpack.c.bf16 %v582_v27, %v581_v5 }
 0x37f   :  { %v1415_v33 = vunpack.i.h.bf16 %v1413_v14  ;;  %v1414_v34 = vunpack.i.l.bf16 %v1413_v14  ;;  %v1152_v56 = vpack.c.bf16 %v578_v28, %v577_v17  ;;  %v1126_v54 = vpack.c.bf16 %v586_v30, %v585_v36 }
 0x380   :  { %709 = vmatpush1.bf16.msra.mxu0 %v623_v47 }
 0x381   :  { %v592_v38 = vsel %vm167_vm2, %v1415_v33, %v1410_v49  ;;  %v591_v44 = vsel %vm167_vm2, %v1414_v34, %v1409_v59  ;;  %v1418_v52 = vpop.permute.xlu1 %1417  ;;  %1150 = vmatprep.subr.msk.bf16.mxu0 %vm1815_vm8, %v1149_v15  ;;  %656 = vmatpush1.bf16.msra.mxu1 %v621_v6 }
 0x382   :  { %v1155_v45 = vpack.c.bf16 %v592_v38, %v591_v44  ;;  %v1420_v4 = vunpack.i.h.bf16 %v1418_v52  ;;  %v1419_v46 = vunpack.i.l.bf16 %v1418_v52  ;;  %v1423_v32 = vpop.permute.xlu0 %1422  ;;  %1124 = vmatprep.subr.msk.bf16.mxu1 %vm1815_vm8, %v1123_v31 }
 0x383   :  { %v1425_v40 = vunpack.i.h.bf16 %v1423_v32  ;;  %v1424_v47 = vunpack.i.l.bf16 %v1423_v32 }
 0x384   :  { %v588_v60 = vsel %vm167_vm2, %v1410_v49, %v1420_v4  ;;  %1153 = vmatpush1.bf16.msk.msra.mxu0 %vm1815_vm8, %v1152_v56  ;;  %v587_v10 = vsel %vm167_vm2, %v1409_v59, %v1419_v46 }
 0x385   :  { %v584_v1 = vsel %vm167_vm2, %v1420_v4, %v1425_v40  ;;  %v579_v2 = vsel %vm167_vm2, %v1424_v47, %v1414_v34  ;;  %v580_v6 = vsel %vm167_vm2, %v1425_v40, %v1415_v33  ;;  %1156 = vmatprep.subr.msk.bf16.mxu0 %vm1815_vm8, %v1155_v45  ;;  %v583_v11 = vsel %vm167_vm2, %v1419_v46, %v1424_v47 }
 0x386   :  { %v1158_v12 = vpack.c.bf16 %v580_v6, %v579_v2  ;;  %1127 = vmatpush1.bf16.msk.msra.mxu1 %vm1815_vm8, %v1126_v54  ;;  %v1129_v13 = vpack.c.bf16 %v584_v1, %v583_v11  ;;  %v1132_v9 = vpack.c.bf16 %v588_v60, %v587_v10 }
 0x388   :  { %1159 = vmatpush1.bf16.msk.msra.mxu0 %vm1815_vm8, %v1158_v12  ;;  %1130 = vmatprep.subr.msk.bf16.mxu1 %vm1815_vm8, %v1129_v13 }
 0x38a   :  { %1133 = vmatpush1.bf16.msk.msra.mxu1 %vm1815_vm8, %v1132_v9 }
 0x38b   :  { %1160 = vmatmul.mubr.msk.bf16.vlgmr.msra.gmra.mrb[4].mxu0 %vm394_vm9, %v1508_v7 }
 0x38c   :  { %744 = vmatprep.mubr.bf16.mxu0 %v1562_v8 }
 0x38d   :  { %1134 = vmatmul.mubr.msk.bf16.vlgmr.msra.gmra.mrb[8].mxu1 %vm394_vm9, %v1508_v7 }
 0x38e   :  { %691 = vmatprep.mubr.bf16.mxu1 %v1562_v8 }
 0x393   :  { %1161 = vmatmul.mubr.msk.bf16.gmra.mrb[8].mxu0 %vm394_vm9, %v1509_v16 }
 0x394   :  { %999 = vmatprep.mubr.bf16.mxu0 %v1562_v8 }
 0x395   :  { %1135 = vmatmul.mubr.msk.bf16.gmra.mrb[12].mxu1 %vm394_vm9, %v1509_v16 }
 0x396   :  { %958 = vmatprep.mubr.bf16.mxu1 %v1562_v8 }
 0x45e   :  { %v736_v18 = vpop.f32.mrb[4].mxu0 }
 0x45f   :  { %v738_v20 = vpop.f32.mrb[5].mxu0  ;;  %v757_v24 = vmax.f32 %v736_v18, 0.0 }
 0x460   :  { %v683_v22 = vpop.f32.mrb[8].mxu1  ;;  %v740_v23 = vpop.f32.mrb[6].mxu0  ;;  %v758_v37 = vmax.f32 %v738_v20, 0.0 }
 0x461   :  { %v755_v25 = vmax.f32 %v683_v22, 0.0  ;;  %v685_v26 = vpop.f32.mrb[9].mxu1  ;;  %v761_v29 = vmax.f32 %v740_v23, 0.0  ;;  %v742_v35 = vpop.f32.mrb[7].mxu0 }
 0x462   :  { %v756_v39 = vmax.f32 %v685_v26, 0.0  ;;  %v687_v43 = vpop.f32.mrb[10].mxu1  ;;  %v762_v48 = vmax.f32 %v742_v35, 0.0 }
 0x463   :  { %v2086_v57 = vpack.c.bf16 %v761_v29, %v757_v24  ;;  %v759_v58 = vmax.f32 %v687_v43, 0.0  ;;  %v689_v50 = vpop.f32.mrb[11].mxu1  ;;  %v1426_v61 = vpack.i.bf16 %v761_v29, %v757_v24 }
 0x464   :  { %v760_v62 = vmax.f32 %v689_v50, 0.0  ;;  %v1431_v8 = vpack.i.bf16 %v762_v48, %v758_v37  ;;  %v2088_v63 = vpack.c.bf16 %v762_v48, %v758_v37 }
 0x465   :  { %v2090_v0 = vpack.c.bf16 %v759_v58, %v755_v25  ;;  %1427 = vrot.lane.b32.xlu1 %v1426_v61, %s1565_s17  ;;  %v1436_v15 = vpack.i.bf16 %v759_v58, %v755_v25 }
 0x466   :  { %1432 = vrot.lane.b32.xlu0 %v1431_v8, %s1565_s17  ;;  %v746_v19 = vpop.f32.mrb[8].mxu0  ;;  %v1441_v27 = vpack.i.bf16 %v760_v62, %v756_v39  ;;  %v2094_v5 = vpack.c.bf16 %v760_v62, %v756_v39 }
 0x467   :  { %v748_v49 = vpop.f32.mrb[9].mxu0  ;;  %v765_v17 = vmax.f32 %v746_v19, 0.0 }
 0x468   :  { %v693_v59 = vpop.f32.mrb[12].mxu1  ;;  %v750_v14 = vpop.f32.mrb[10].mxu0  ;;  %v766_v30 = vmax.f32 %v748_v49, 0.0 }
 0x469   :  { %v763_v28 = vmax.f32 %v693_v59, 0.0  ;;  %v695_v33 = vpop.f32.mrb[13].mxu1  ;;  %v769_v34 = vmax.f32 %v750_v14, 0.0  ;;  %1442 = vrot.lane.b32.xlu1 %v1441_v27, %s1565_s17  ;;  %v752_v36 = vpop.f32.mrb[11].mxu0 }
 0x46a   :  { %v764_v31 = vmax.f32 %v695_v33, 0.0  ;;  %v697_v38 = vpop.f32.mrb[14].mxu1  ;;  %v770_v44 = vmax.f32 %v752_v36, 0.0  ;;  %1437 = vrot.lane.b32.xlu0 %v1436_v15, %s1565_s17 }
 0x46b   :  { %v2098_v52 = vpack.c.bf16 %v769_v34, %v765_v17  ;;  %v767_v56 = vmax.f32 %v697_v38, 0.0  ;;  %v699_v45 = vpop.f32.mrb[15].mxu1  ;;  %v1446_v4 = vpack.i.bf16 %v769_v34, %v765_v17 }
 0x46c   :  { %v768_v46 = vmax.f32 %v699_v45, 0.0  ;;  %v1451_v32 = vpack.i.bf16 %v770_v44, %v766_v30  ;;  %v2100_v40 = vpack.c.bf16 %v770_v44, %v766_v30 }
 0x46d   :  { %v2102_v47 = vpack.c.bf16 %v767_v56, %v763_v28  ;;  %1447 = vrot.lane.b32.xlu1 %v1446_v4, %s1565_s17  ;;  %v1456_v54 = vpack.i.bf16 %v767_v56, %v763_v28 }
 0x46e   :  { %1452 = vrot.lane.b32.xlu0 %v1451_v32, %s1565_s17  ;;  %v1461_v60 = vpack.i.bf16 %v768_v46, %v764_v31  ;;  %v2106_v10 = vpack.c.bf16 %v768_v46, %v764_v31 }
 0x471   :  { %1462 = vrot.lane.b32.xlu1 %v1461_v60, %s1565_s17 }
 0x472   :  { %1457 = vrot.lane.b32.xlu0 %v1456_v54, %s1565_s17 }
 0x475   :  { %1467 = vrot.lane.b32.xlu1 %v1436_v15, %s1564_s2 }
 0x476   :  { %1472 = vrot.lane.b32.xlu0 %v1431_v8, %s1564_s2 }
 0x479   :  { %1477 = vrot.lane.b32.xlu1 %v1426_v61, %s1564_s2 }
 0x47a   :  { %1482 = vrot.lane.b32.xlu0 %v1441_v27, %s1564_s2 }
 0x47d   :  { %1487 = vrot.lane.b32.xlu1 %v1456_v54, %s1564_s2 }
 0x47e   :  { %1492 = vrot.lane.b32.xlu0 %v1451_v32, %s1564_s2 }
 0x481   :  { %1497 = vrot.lane.b32.xlu1 %v1446_v4, %s1564_s2 }
 0x482   :  { %1502 = vrot.lane.b32.xlu0 %v1461_v60, %s1564_s2 }
 0x4d7   :  { %v1428_v1 = vpop.permute.xlu1 %1427 }
 0x4d8   :  { %v1430_v2 = vunpack.i.h.bf16 %v1428_v1  ;;  %v1429_v6 = vunpack.i.l.bf16 %v1428_v1  ;;  %v1433_v11 = vpop.permute.xlu0 %1432 }
 0x4d9   :  { %v1435_v12 = vunpack.i.h.bf16 %v1433_v11  ;;  %v1434_v13 = vunpack.i.l.bf16 %v1433_v11 }
 0x4db   :  { %v804_v7 = vsel %vm158_vm1, %v1430_v2, %v1435_v12  ;;  %v803_v9 = vsel %vm158_vm1, %v1429_v6, %v1434_v13  ;;  %v1443_v16 = vpop.permute.xlu1 %1442 }
 0x4dc   :  { %v1188_v18 = vpack.c.bf16 %v804_v7, %v803_v9  ;;  %v1445_v20 = vunpack.i.h.bf16 %v1443_v16  ;;  %v1444_v22 = vunpack.i.l.bf16 %v1443_v16  ;;  %v1438_v23 = vpop.permute.xlu0 %1437 }
 0x4dd   :  { %v1440_v24 = vunpack.i.h.bf16 %v1438_v23  ;;  %v1439_v25 = vunpack.i.l.bf16 %v1438_v23 }
 0x4de   :  { %v807_v26 = vsel %vm158_vm1, %v1444_v22, %v1429_v6  ;;  %v808_v29 = vsel %vm158_vm1, %v1445_v20, %v1430_v2  ;;  %1189 = vmatprep.subr.msk.bf16.mxu0 %vm1777_vm6, %v1188_v18 }
 0x4df   :  { %v1191_v35 = vpack.c.bf16 %v808_v29, %v807_v26  ;;  %v812_v37 = vsel %vm158_vm1, %v1440_v24, %v1445_v20  ;;  %v811_v39 = vsel %vm158_vm1, %v1439_v25, %v1444_v22  ;;  %v815_v43 = vsel %vm158_vm1, %v1434_v13, %v1439_v25  ;;  %v1448_v48 = vpop.permute.xlu1 %1447 }
 0x4e0   :  { %v816_v58 = vsel %vm158_vm1, %v1435_v12, %v1440_v24  ;;  %v1163_v50 = vpack.c.bf16 %v812_v37, %v811_v39  ;;  %v1450_v61 = vunpack.i.h.bf16 %v1448_v48  ;;  %v1449_v62 = vunpack.i.l.bf16 %v1448_v48  ;;  %v1453_v8 = vpop.permute.xlu0 %1452 }
 0x4e1   :  { %v1166_v15 = vpack.c.bf16 %v816_v58, %v815_v43  ;;  %v1455_v19 = vunpack.i.h.bf16 %v1453_v8  ;;  %v1454_v27 = vunpack.i.l.bf16 %v1453_v8  ;;  %1192 = vmatpush1.bf16.msk.msra.mxu0 %vm1777_vm6, %v1191_v35 }
 0x4e2   :  { %1164 = vmatprep.subr.msk.bf16.mxu1 %vm1777_vm6, %v1163_v50 }
 0x4e3   :  { %v806_v49 = vsel %vm158_vm1, %v1450_v61, %v1455_v19  ;;  %v805_v59 = vsel %vm158_vm1, %v1449_v62, %v1454_v27  ;;  %1167 = vmatpush1.bf16.msk.msra.mxu1 %vm1777_vm6, %v1166_v15  ;;  %v1463_v14 = vpop.permute.xlu1 %1462 }
 0x4e4   :  { %v1194_v17 = vpack.c.bf16 %v806_v49, %v805_v59  ;;  %v1465_v28 = vunpack.i.h.bf16 %v1463_v14  ;;  %v1464_v33 = vunpack.i.l.bf16 %v1463_v14  ;;  %v1458_v34 = vpop.permute.xlu0 %1457 }
 0x4e5   :  { %v1460_v36 = vunpack.i.h.bf16 %v1458_v34  ;;  %v1459_v30 = vunpack.i.l.bf16 %v1458_v34 }
 0x4e6   :  { %v809_v31 = vsel %vm158_vm1, %v1464_v33, %v1449_v62  ;;  %v810_v38 = vsel %vm158_vm1, %v1465_v28, %v1450_v61  ;;  %1195 = vmatprep.subr.msk.bf16.mxu0 %vm1777_vm6, %v1194_v17 }
 0x4e7   :  { %v1197_v44 = vpack.c.bf16 %v810_v38, %v809_v31  ;;  %v814_v56 = vsel %vm158_vm1, %v1460_v36, %v1465_v28  ;;  %v813_v45 = vsel %vm158_vm1, %v1459_v30, %v1464_v33  ;;  %v817_v4 = vsel %vm158_vm1, %v1454_v27, %v1459_v30  ;;  %v1468_v46 = vpop.permute.xlu1 %1467  ;;  %v153_v30 = vld [vmem:[%s2263_s8] sm:$0x1]  ;;  %s1567_s8 = smov [#allocation4]  }
 0x4e8   :  { %v818_v32 = vsel %vm158_vm1, %v1455_v19, %v1460_v36  ;;  %v1169_v54 = vpack.c.bf16 %v814_v56, %v813_v45  ;;  %v1470_v60 = vunpack.i.h.bf16 %v1468_v46  ;;  %v1469_v1 = vunpack.i.l.bf16 %v1468_v46  ;;  %v1473_v2 = vpop.permute.xlu0 %1472  ;;  %s1058_s28 = sshll.u32 %s1567_s8, 4  ;;  %s1059_s28 = int_to_ptr.vmem [resolvable:$true] %s1058_s28 }
 0x4e9   :  { %v1172_v6 = vpack.c.bf16 %v818_v32, %v817_v4  ;;  %v1475_v11 = vunpack.i.h.bf16 %v1473_v2  ;;  %v1474_v12 = vunpack.i.l.bf16 %v1473_v2  ;;  %1198 = vmatpush1.bf16.msk.msra.mxu0 %vm1777_vm6, %v1197_v44  ;;  %v1012_v31 = vunpack.c.l.s4 %v1566_v55  ;;  %s1510_s30 = scalar_lea.vmem %s1059_s28, 32  ;;  %p1515_p1 = scmp.lt.s32.totalorder %s1059_s28, %s1059_s28 }
 0x4ea   :  { %1170 = vmatprep.subr.msk.bf16.mxu1 %vm1777_vm6, %v1169_v54  ;;  %971 = vmatprep.subr.bf16.mxu0 %v2088_v63  ;;  %p1511_p0 = scmp.ne.s32.totalorder %s1059_s28, %s1510_s30  ;;  %p1516_p2 = scmp.lt.s32.totalorder %s1510_s30, %s1510_s30 }
 0x4eb   :  { %v1478_v13 = vpop.permute.xlu1 %1477  ;;  %1173 = vmatpush1.bf16.msk.msra.mxu1 %vm1777_vm6, %v1172_v6  ;;  %v880_v7 = vsel %vm167_vm2, %v1475_v11, %v1470_v60  ;;  %v879_v9 = vsel %vm167_vm2, %v1474_v12, %v1469_v1  ;;  %v1013_v38 = vunpack.c.0.s8 %v1012_v31 }
 0x4ec   :  { %v1480_v16 = vunpack.i.h.bf16 %v1478_v13  ;;  %v1479_v18 = vunpack.i.l.bf16 %v1478_v13  ;;  %v1483_v20 = vpop.permute.xlu0 %1482  ;;  %930 = vmatprep.subr.bf16.mxu1 %v2094_v5  ;;  %v1200_v63 = vpack.c.bf16 %v880_v7, %v879_v9  ;;  %p1517_p3 = por %p1516_p2, %p1515_p1 }
 0x4ed   :  { %v1485_v22 = vunpack.i.h.bf16 %v1483_v20  ;;  %v1484_v23 = vunpack.i.l.bf16 %v1483_v20  ;;  %972 = vmatpush1.bf16.msra.mxu0 %v2086_v57  ;;  %v1016_v4 = vsub.s32 %v1013_v38, %v1721_v53 }
 0x4ee   :  { %973 = vmatprep.subr.bf16.mxu0 %v2100_v40  ;;  %v867_v26 = vsel %vm167_vm2, %v1479_v18, %v1474_v12  ;;  %v868_v5 = vsel %vm167_vm2, %v1480_v16, %v1475_v11  ;;  %p1518_p4 = pnand %p1517_p3, %p1511_p0 }
 0x4ef   :  { %v872_v21 = vsel %vm167_vm2, %v1485_v22, %v1480_v16  ;;  %v871_v24 = vsel %vm167_vm2, %v1484_v23, %v1479_v18  ;;  %v1488_v25 = vpop.permute.xlu1 %1487  ;;  %931 = vmatpush1.bf16.msra.mxu1 %v2090_v0  ;;  %v876_v39 = vsel %vm167_vm2, %v1470_v60, %v1485_v22  ;;  %v875_v0 = vsel %vm167_vm2, %v1469_v1, %v1484_v23 }
 0x4f0   :  { %v1490_v29 = vunpack.i.h.bf16 %v1488_v25  ;;  %v1489_v57 = vunpack.i.l.bf16 %v1488_v25  ;;  %v1493_v35 = vpop.permute.xlu0 %1492  ;;  %932 = vmatprep.subr.bf16.mxu1 %v2106_v10  ;;  %v1175_v43 = vpack.c.bf16 %v872_v21, %v871_v24  ;;  %v1203_v48 = vpack.c.bf16 %v868_v5, %v867_v26 }
 0x4f1   :  { %v1495_v40 = vunpack.i.h.bf16 %v1493_v35  ;;  %v1494_v37 = vunpack.i.l.bf16 %v1493_v35  ;;  %974 = vmatpush1.bf16.msra.mxu0 %v2098_v52  ;;  %v1178_v15 = vpack.c.bf16 %v876_v39, %v875_v0 }
 0x4f2   :  { %1201 = vmatprep.subr.msk.bf16.mxu0 %vm1815_vm8, %v1200_v63 }
 0x4f3   :  { %v882_v58 = vsel %vm167_vm2, %v1495_v40, %v1490_v29  ;;  %v881_v10 = vsel %vm167_vm2, %v1494_v37, %v1489_v57  ;;  %v1498_v50 = vpop.permute.xlu1 %1497  ;;  %933 = vmatpush1.bf16.msra.mxu1 %v2102_v47 }
 0x4f4   :  { %v1206_v52 = vpack.c.bf16 %v882_v58, %v881_v10  ;;  %v1500_v61 = vunpack.i.h.bf16 %v1498_v50  ;;  %v1499_v62 = vunpack.i.l.bf16 %v1498_v50  ;;  %v1503_v8 = vpop.permute.xlu0 %1502  ;;  %1176 = vmatprep.subr.msk.bf16.mxu1 %vm1815_vm8, %v1175_v43 }
 0x4f5   :  { %v1505_v19 = vunpack.i.h.bf16 %v1503_v8  ;;  %v1504_v27 = vunpack.i.l.bf16 %v1503_v8  ;;  %1204 = vmatpush1.bf16.msk.msra.mxu0 %vm1815_vm8, %v1203_v48 }
 0x4f6   :  { %v869_v49 = vsel %vm167_vm2, %v1499_v62, %v1494_v37  ;;  %v870_v59 = vsel %vm167_vm2, %v1500_v61, %v1495_v40  ;;  %1207 = vmatprep.subr.msk.bf16.mxu0 %vm1815_vm8, %v1206_v52 }
 0x4f7   :  { %v1209_v47 = vpack.c.bf16 %v870_v59, %v869_v49  ;;  %v874_v14 = vsel %vm167_vm2, %v1505_v19, %v1500_v61  ;;  %v878_v17 = vsel %vm167_vm2, %v1490_v29, %v1505_v19  ;;  %v873_v28 = vsel %vm167_vm2, %v1504_v27, %v1499_v62  ;;  %1179 = vmatpush1.bf16.msk.msra.mxu1 %vm1815_vm8, %v1178_v15 }
 0x4f8   :  { %v877_v33 = vsel %vm167_vm2, %v1489_v57, %v1504_v27  ;;  %v1181_v34 = vpack.c.bf16 %v874_v14, %v873_v28 }
 0x4f9   :  { %v1184_v36 = vpack.c.bf16 %v878_v17, %v877_v33  ;;  %1210 = vmatpush1.bf16.msk.msra.mxu0 %vm1815_vm8, %v1209_v47 }
 0x4fa   :  { %1182 = vmatprep.subr.msk.bf16.mxu1 %vm1815_vm8, %v1181_v34 }
 0x4fb   :  { %1185 = vmatpush1.bf16.msk.msra.mxu1 %vm1815_vm8, %v1184_v36 }
 0x4fc   :  { %1211 = vmatmul.mubr.msk.bf16.vlgmr.msra.gmra.mrb[12].mxu0 %vm394_vm9, %v153_v30 }
 0x4fe   :  { %1186 = vmatmul.mubr.msk.bf16.vlgmr.msra.gmra.mrb[16].mxu1 %vm394_vm9, %v153_v30 }
 0x5cf   :  { %v1001_v44 = vpop.f32.mrb[12].mxu0 }
 0x5d0   :  { %v1031_v56 = vsub.f32 %v1001_v44, %v1705_v41  ;;  %v1003_v45 = vpop.f32.mrb[13].mxu0 }
 0x5d1   :  { %v1032_v46 = vsub.f32 %v1003_v45, %v1712_v42  ;;  %v960_v32 = vpop.f32.mrb[16].mxu1  ;;  %v1005_v54 = vpop.f32.mrb[14].mxu0 }
 0x5d2   :  { %v962_v60 = vpop.f32.mrb[17].mxu1  ;;  %v1006_v3 = vpop.f32.mrb[15].mxu0 }
 0x5d3   :  { %v1035_v1 = vcombine.low %v1031_v56, %v1032_v46  ;;  %v1010_v2 = vcombine.low %v960_v32, %v962_v60  ;;  %v964_v6 = vpop.f32.mrb[18].mxu1 }
 0x5d4   :  { %v965_v11 = vpop.f32.mrb[19].mxu1 }
 0x5d5   :  { %v1042_v12 = vrot.slane %v1035_v1, %v1016_v4  ;;  %v1017_v13 = vrot.slane %v1010_v2, %v1016_v4 }
 0x5d7   :  { %v1024_v41 = vrot.slane %v1017_v13, %v1016_v4  ;;  %v1049_v53 = vrot.slane %v1042_v12, %v1016_v4 }
 0x5d9   :  { %1030 = vst.msk [vmem:[#allocation4] sm:$0x3] %vm1028_vm10, %v1024_v41  ;;  %1051 = vst.msk [vmem:[#allocation6] sm:$0x3] %vm1028_vm10, %v1049_v53 }
 0x5da   :  { %1521 = shalt.err (!%p1518_p4)
}
 0x5db   :  { %s1522_s13 = scalar_lea.hbm %s2264_s9, 32 }
 0x5dc   :  { %p1523_p5 = scmp.ne.s32.totalorder %s2264_s9, %s1522_s13  ;;  %p1526_p6 = scmp.lt.u32.totalorder %s1522_s13, %s2264_s9 }
 0x5de   :  { %p1528_p7 = pnand %p1526_p6, %p1523_p5 }
 0x5e0   :  { %1531 = shalt.err (!%p1528_p7)
}
 0x5e1   :  { %1061 = dma.vmem_to_hbm [thread:$0]  %s1059_s28, 32, %s2264_s9, [#allocation5]  }
 0x5e2   :  { %s1532_s0 = scalar_lea.vmem %s1069_s29, 32  ;;  %p1537_p9 = scmp.lt.s32.totalorder %s1069_s29, %s1069_s29 }
 0x5e3   :  { %p1533_p8 = scmp.ne.s32.totalorder %s1069_s29, %s1532_s0  ;;  %p1538_p10 = scmp.lt.s32.totalorder %s1532_s0, %s1532_s0 }
 0x5e5   :  { %p1539_p11 = por %p1538_p10, %p1537_p9 }
 0x5e7   :  { %p1540_p12 = pnand %p1539_p11, %p1533_p8 }
 0x5e9   :  { %1543 = shalt.err (!%p1540_p12)
}
 0x5ea   :  { %s1544_s19 = scalar_lea.hbm %s2265_s10, 32 }
 0x5eb   :  { %p1545_p13 = scmp.ne.s32.totalorder %s2265_s10, %s1544_s19  ;;  %p1548_p0 = scmp.lt.u32.totalorder %s1544_s19, %s2265_s10 }
 0x5ed   :  { %p1550_p1 = pnand %p1548_p0, %p1545_p13 }
 0x5ef   :  { %1553 = shalt.err (!%p1550_p1)
}
 0x5f0   :  { %1071 = dma.vmem_to_hbm [thread:$0]  %s1069_s29, 32, %s2265_s10, [#allocation7]  }
 0x5f1   :  { %1554 = dma.done.wait [#allocation5], 32  }
 0x5f2   :  { %1555 = vsyncadd [#allocation5], 4294967264 }
 0x5f3   :  { %1556 = dma.done.wait [#allocation7], 32  }
 0x5f4   :  { %1557 = vsyncadd [#allocation7], 4294967264 }
 0x5f5   :  { %1078 = vsyncpa [#allocation5], 1 }
 0x5f6   :  { %1079 = vsyncpa [#allocation7], 1 }

</bundles_post_ra>
